<compile_context>
chip_gen: v7x
topology: tpu7x:2x2x1
jax: 0.10.0
libtpu: 0.0.40
codegen_flags: <defaults>
</compile_context>

<pallas_src>
from functools import partial

import jax
import jax.numpy as jnp
from jax import lax
from jax.experimental import pallas as pl
from jax.experimental.pallas import tpu as pltpu

SOLVER_FWD_MAX_ITER = 30
SOLVER_FWD_TOL = 1e-4
_EPS = 1e-8


def _deq_fixed_point_kernel(x_ref, w_ref, b_ref, z_ref, *, lhs_state, use_bf16):
    """Fixed-point solve for one independent tile of rows.

    lhs_state=True : state z is (tile_m, D), f(z) = tanh(z @ W + x + b).
    lhs_state=False: state z is (D, tile_m) (M on the lane axis), w_ref holds
                     W^T and f(z) = tanh(W^T @ z + (x + b)^T).
    """
    w = w_ref[...]                        # pinned VMEM-resident across the grid
    xb = x_ref[...] + b_ref[...]          # hoisted injection + bias

    tol_sq = jnp.float32(SOLVER_FWD_TOL * SOLVER_FWD_TOL)
    eps = jnp.float32(_EPS)

    def f(z):
        zi = z.astype(jnp.bfloat16) if use_bf16 else z
        if lhs_state:
            zw = jnp.dot(zi, w, preferred_element_type=jnp.float32)
        else:
            zw = jnp.dot(w, zi, preferred_element_type=jnp.float32)
        return jnp.tanh(zw + xb)

    # Iteration 0 hoisted: z0 = zeros -> z1 = tanh(0 @ W + x + b) = tanh(x + b).
    z1 = jnp.tanh(xb)

    def cond(carry):
        it, _ = carry
        return it < SOLVER_FWD_MAX_ITER

    def body(carry):
        it, z = carry
        # Two Picard steps per residual check (amortizes the reductions and the
        # vector->scalar sync on the strictly serial z_{k+1}(z_k) path).
        za = f(z)
        zb = f(za)
        # Relative L2 residual in squared form (no sqrt / divide):
        #   ||zb - za||^2 < tol^2 * (||zb||^2 + eps)
        diff = zb - za
        num_sq = jnp.sum(diff * diff)
        den_sq = jnp.sum(zb * zb)
        converged = num_sq < tol_sq * (den_sq + eps)
        # Early exit: jump the counter to max_iter once converged.
        it_next = jnp.where(converged, jnp.int32(SOLVER_FWD_MAX_ITER), it + 2)
        return (it_next, zb)

    _, z_star = lax.while_loop(cond, body, (jnp.int32(1), z1))
    z_ref[...] = z_star.astype(z_ref.dtype)


def _round_up(v, m):
    return ((v + m - 1) // m) * m


def _vmem_limit_bytes():
    """~85% of per-core VMEM (64 MiB v7x / 128 MiB v5e-v6e), capped at 100 MiB."""
    cap = 64 << 20
    try:
        cap = int(pltpu.get_tpu_info().vmem_capacity_bytes)
    except Exception:
        pass
    return max(32 << 20, min(int(cap * 0.85), 100 << 20))


def _choose_tile_m(M, D, vmem_limit, granule, w_elem_bytes):
    """Largest MXU-friendly row tile that fits the per-chip VMEM budget."""
    bytes_per_row = 4 * D * 9             # 2 in-bufs + 2 out-bufs + ~5 live f32 temps
    w_bytes = 2 * w_elem_bytes * D * D    # pinned W (pipeliner double-buffers it)
    avail = int(vmem_limit * 0.7) - w_bytes
    cap = (max(avail, 0) // bytes_per_row) // granule * granule
    cap = max(granule, min(1024, cap))
    if M <= cap:
        return _round_up(M, granule)
    # Prefer an even number of tiles so ("parallel",) balances v7x's two TCs.
    n_tiles = -(-M // cap)
    if n_tiles % 2:
        n_tiles += 1
    return max(granule, _round_up(-(-M // n_tiles), granule))


def deq_fixed_point(x, w, b, *, use_bf16_matmul=None):
    """DEQFixedPoint.forward in eval mode.

    x: (..., D) float (leading dims flattened to M independent rows)
    w: (D, D), b: (D,)
    returns z_star with x's shape (float32).
    """
    orig_shape = x.shape
    D = x.shape[-1]
    M = 1
    for s in x.shape[:-1]:
        M *= s

    x_flat = x.reshape(M, D).astype(jnp.float32)
    w = w.astype(jnp.float32)
    b = b.astype(jnp.float32)

    if use_bf16_matmul is None:
        # bf16 MXU inputs (f32 accumulation) only in the matmul-dominated regime;
        # must stay validated against the 1e-4 relative tolerance.
        use_bf16_matmul = D >= 256
    w_mat = w.astype(jnp.bfloat16) if use_bf16_matmul else w

    vmem_limit = _vmem_limit_bytes()
    lhs_state = D >= 128                  # row-major state only when D fills lanes
    granule = 8 if lhs_state else 128     # M sits on sublanes (8) or lanes (128)
    tile_m = _choose_tile_m(M, D, vmem_limit, granule, 2 if use_bf16_matmul else 4)
    m_pad = _round_up(M, tile_m)
    if m_pad != M:
        # Padded zero rows are independent, finite fixed points; sliced off below.
        x_flat = jnp.pad(x_flat, ((0, m_pad - M), (0, 0)))
    grid = (m_pad // tile_m,)

    kernel = partial(_deq_fixed_point_kernel,
                     lhs_state=lhs_state, use_bf16=use_bf16_matmul)
    cost = pl.CostEstimate(
        flops=2 * m_pad * D * D * SOLVER_FWD_MAX_ITER,
        transcendentals=m_pad * D * SOLVER_FWD_MAX_ITER,
        bytes_accessed=4 * (2 * m_pad * D + D * D),
    )
    cparams = pltpu.CompilerParams(
        dimension_semantics=("parallel",),   # independent row tiles -> megacore
        vmem_limit_bytes=vmem_limit,
    )

    if lhs_state:
        z_flat = pl.pallas_call(
            kernel,
            out_shape=jax.ShapeDtypeStruct((m_pad, D), jnp.float32),
            grid_spec=pltpu.PrefetchScalarGridSpec(
                num_scalar_prefetch=0,
                grid=grid,
                in_specs=[
                    pl.BlockSpec((tile_m, D), lambda i: (i, 0)),  # x: pipelined
                    pl.BlockSpec((D, D), lambda i: (0, 0)),       # W: pinned
                    pl.BlockSpec((1, D), lambda i: (0, 0)),       # b: pinned
                ],
                out_specs=pl.BlockSpec((tile_m, D), lambda i: (i, 0)),
            ),
            compiler_params=cparams,
            cost_estimate=cost,
        )(x_flat, w_mat, b.reshape(1, D))
    else:
        # Small D: transpose so M is the lane axis -> lane-dense, unmasked stores.
        z_t = pl.pallas_call(
            kernel,
            out_shape=jax.ShapeDtypeStruct((D, m_pad), jnp.float32),
            grid_spec=pltpu.PrefetchScalarGridSpec(
                num_scalar_prefetch=0,
                grid=grid,
                in_specs=[
                    pl.BlockSpec((D, tile_m), lambda i: (0, i)),  # x^T: pipelined
                    pl.BlockSpec((D, D), lambda i: (0, 0)),       # W^T: pinned
                    pl.BlockSpec((D, 1), lambda i: (0, 0)),       # b:   pinned
                ],
                out_specs=pl.BlockSpec((D, tile_m), lambda i: (0, i)),
            ),
            compiler_params=cparams,
            cost_estimate=cost,
        )(x_flat.T, w_mat.T, b.reshape(D, 1))
        z_flat = z_t.T

    # unpack_state = identity, output_elements=[0] -> single tensor.
    return z_flat[:M].reshape(orig_shape)


if __name__ == "__main__":
    key = jax.random.PRNGKey(0)
    k_x, k_w, k_b = jax.random.split(key, 3)

    B, N, D = 2, 8, 32   # batch=2, seq=8, hidden=32
    x = jax.random.normal(k_x, (B, N, D), dtype=jnp.float32)

    # Small-scale init keeps the map contractive so Picard converges in ~8 steps.
    w = 0.1 * jax.random.normal(k_w, (D, D), dtype=jnp.float32) / jnp.sqrt(D)
    b = 0.01 * jax.random.normal(k_b, (D,), dtype=jnp.float32)

    z_star = deq_fixed_point(x, w, b)
    jax.block_until_ready(z_star)

    # Check 1: z_star is a fixed point of f(z) = tanh(z @ W + x + b) to within
    # the solver tolerance (the contraction shrinks the residual further).
    zf = z_star.reshape(-1, D)
    xf = x.reshape(-1, D)
    fz = jnp.tanh(jnp.dot(zf, w) + xf + b[None, :])
    rel_res = float(jnp.linalg.norm(fz - zf) / (jnp.linalg.norm(fz) + _EPS))
    assert rel_res < 5.0 * SOLVER_FWD_TOL, f"fixed-point residual too large: {rel_res}"

    # Check 2: matches a fully converged pure-JAX Picard reference.
    def ref_solve(x, w, b, iters=200):
        xr = x.reshape(-1, x.shape[-1]).astype(jnp.float32)
        xb = xr + b[None, :]
        z = jnp.zeros_like(xr)
        for _ in range(iters):
            z = jnp.tanh(jnp.dot(z, w) + xb)
        return z.reshape(x.shape)

    ref = ref_solve(x, w, b)
    assert jnp.allclose(z_star, ref, atol=2e-3, rtol=0.0), "mismatch vs reference"

    print("KERNEL_OK")
</pallas_src>

<mosaic_0001>
module attributes {stable_mosaic.version = 11 : i64} {
  func.func @_deq_fixed_point_kernel(%arg0: i32, %arg1: memref<32x128xf32, #tpu.memory_space<vmem>>, %arg2: memref<32x32xf32, #tpu.memory_space<vmem>>, %arg3: memref<32x1xf32, #tpu.memory_space<vmem>>, %arg4: memref<32x128xf32, #tpu.memory_space<vmem>>) attributes {dimension_semantics = [#tpu.dimension_semantics<parallel>], iteration_bounds = array<i64: 1>, scalar_prefetch = 0 : i64, scratch_operands = 0 : i64, tpu.core_type = #tpu.core_type<tc>, window_params = [{transform_indices = @transform_0, window_bounds = array<i64: 32, 128>}, {pipeline_mode = #tpu.pipeline_mode<synchronous>, transform_indices = @transform_1, window_bounds = array<i64: 32, 32>}, {pipeline_mode = #tpu.pipeline_mode<synchronous>, transform_indices = @transform_2, window_bounds = array<i64: 32, 1>}, {transform_indices = @transform_3, window_bounds = array<i64: 32, 128>}]} {
    %c0 = arith.constant 0 : index
    %c0_0 = arith.constant 0 : index
    %0 = vector.load %arg2[%c0, %c0_0] : memref<32x32xf32, #tpu.memory_space<vmem>>, vector<32x32xf32>
    %c0_1 = arith.constant 0 : index
    %c0_2 = arith.constant 0 : index
    %1 = vector.load %arg1[%c0_1, %c0_2] : memref<32x128xf32, #tpu.memory_space<vmem>>, vector<32x128xf32>
    %c0_3 = arith.constant 0 : index
    %c0_4 = arith.constant 0 : index
    %2 = vector.load %arg3[%c0_3, %c0_4] : memref<32x1xf32, #tpu.memory_space<vmem>>, vector<32x1xf32>
    %3 = vector.broadcast %2 : vector<32x1xf32> to vector<32x128xf32>
    %4 = arith.addf %1, %3 : vector<32x128xf32>
    %5 = math.tanh %4 : vector<32x128xf32>
    %cst = arith.constant 9.99999993E-9 : f32
    %cst_5 = arith.constant 9.99999993E-9 : f32
    %c1_i32 = arith.constant 1 : i32
    %6:2 = scf.while (%arg5 = %c1_i32, %arg6 = %5) : (i32, vector<32x128xf32>) -> (i32, vector<32x128xf32>) {
      %c30_i32 = arith.constant 30 : i32
      %8 = arith.cmpi slt, %arg5, %c30_i32 : i32
      scf.condition(%8) %arg5, %arg6 : i32, vector<32x128xf32>
    } do {
    ^bb0(%arg5: i32, %arg6: vector<32x128xf32>):
      %cst_8 = arith.constant dense<0.000000e+00> : vector<32x128xf32>
      %8 = tpu.matmul %0, %arg6, %cst_8 {dimension_numbers = #tpu.dot_dimension_numbers<[1], [0], [0], [1], [0, 0, 1, 1], [], []>} : vector<32x32xf32>, vector<32x128xf32>, vector<32x128xf32> -> vector<32x128xf32>
      %9 = arith.addf %8, %4 : vector<32x128xf32>
      %10 = math.tanh %9 : vector<32x128xf32>
      %cst_9 = arith.constant dense<0.000000e+00> : vector<32x128xf32>
      %11 = tpu.matmul %0, %10, %cst_9 {dimension_numbers = #tpu.dot_dimension_numbers<[1], [0], [0], [1], [0, 0, 1, 1], [], []>} : vector<32x32xf32>, vector<32x128xf32>, vector<32x128xf32> -> vector<32x128xf32>
      %12 = arith.addf %11, %4 : vector<32x128xf32>
      %13 = math.tanh %12 : vector<32x128xf32>
      %14 = arith.subf %13, %10 : vector<32x128xf32>
      %15 = arith.mulf %14, %14 : vector<32x128xf32>
      %16 = vector.shape_cast %15 : vector<32x128xf32> to vector<1x32x128xf32>
      %cst_10 = arith.constant dense<0.000000e+00> : vector<1xf32>
      %17 = vector.multi_reduction <add>, %16, %cst_10 [1, 2] : vector<1x32x128xf32> to vector<1xf32>
      %18 = vector.shape_cast %17 : vector<1xf32> to vector<1x1x1xf32>
      %19 = vector.extract %18[0, 0, 0] : f32 from vector<1x1x1xf32>
      %20 = arith.mulf %13, %13 : vector<32x128xf32>
      %21 = vector.shape_cast %20 : vector<32x128xf32> to vector<1x32x128xf32>
      %cst_11 = arith.constant dense<0.000000e+00> : vector<1xf32>
      %22 = vector.multi_reduction <add>, %21, %cst_11 [1, 2] : vector<1x32x128xf32> to vector<1xf32>
      %23 = vector.shape_cast %22 : vector<1xf32> to vector<1x1x1xf32>
      %24 = vector.extract %23[0, 0, 0] : f32 from vector<1x1x1xf32>
      %25 = arith.addf %24, %cst : f32
      %26 = arith.mulf %cst_5, %25 : f32
      %27 = arith.cmpf olt, %19, %26 : f32
      %c2_i32 = arith.constant 2 : i32
      %28 = arith.addi %arg5, %c2_i32 : i32
      %c30_i32 = arith.constant 30 : i32
      %29 = arith.select %27, %c30_i32, %28 : i32
      scf.yield %29, %13 : i32, vector<32x128xf32>
    }
    %c0_6 = arith.constant 0 : index
    %c0_7 = arith.constant 0 : index
    %7 = vector.load %arg4[%c0_6, %c0_7] : memref<32x128xf32, #tpu.memory_space<vmem>>, vector<32x128xf32>
    tpu.vector_store %arg4[%c0_6, %c0_7], %6#1 {strides = array<i32>} : memref<32x128xf32, #tpu.memory_space<vmem>>, vector<32x128xf32>,
    return
  }
  func.func @transform_0(%arg0: i32) -> (i32, i32) {
    %c0_i32 = arith.constant 0 : i32
    %c0_i32_0 = arith.constant 0 : i32
    return %c0_i32, %arg0 : i32, i32
  }
  func.func @transform_1(%arg0: i32) -> (i32, i32) {
    %c0_i32 = arith.constant 0 : i32
    %c0_i32_0 = arith.constant 0 : i32
    %c0_i32_1 = arith.constant 0 : i32
    return %c0_i32, %c0_i32_0 : i32, i32
  }
  func.func @transform_2(%arg0: i32) -> (i32, i32) {
    %c0_i32 = arith.constant 0 : i32
    %c0_i32_0 = arith.constant 0 : i32
    %c0_i32_1 = arith.constant 0 : i32
    return %c0_i32, %c0_i32_0 : i32, i32
  }
  func.func @transform_3(%arg0: i32) -> (i32, i32) {
    %c0_i32 = arith.constant 0 : i32
    %c0_i32_0 = arith.constant 0 : i32
    return %c0_i32, %arg0 : i32, i32
  }
}

</mosaic_0001>

<bundles_post_ra>
// kernel: tpu_custom_call.1
= control target key start
LH: loop header
LB: loop body
LE: loop exit
PB: predicated region body
PF: predicated region fallthrough
CT: control target
= control target key end

     0   :  { %8 = vsyncpa [#allocation3], 0  ;;  %s733_s0 = inlined_call_operand.vmem [shape: f32[32,128], index: 0, kind: input, shape index: {}]   ;;  %s734_s1 = inlined_call_operand.hbm [shape: f32[32,32], index: 1, kind: input, shape index: {}]   ;;  %s735_s2 = inlined_call_operand.vmem [shape: f32[32,1], index: 2, kind: input, shape index: {}]   ;;  %s736_s3 = inlined_call_operand.hbm [shape: f32[32,128], index: 3, kind: output, shape index: {}]  }
   0x1   :  { %9 = vsyncpa [#allocation4], 0  ;;  %s582_s12 = smov [#allocation2]   ;;  %s494_s16 = scalar_lea.hbm %s734_s1, 512 }
   0x2   :  { %s17_s13 = sshll.u32 %s582_s12, 4  ;;  %p495_p0 = scmp.ne.s32.totalorder %s734_s1, %s494_s16  ;;  %s18_s13 = int_to_ptr.vmem [resolvable:$true] %s17_s13 }
   0x3   :  { %p498_p1 = scmp.lt.u32.totalorder %s494_s16, %s734_s1 }
   0x5   :  { %p500_p2 = pnand %p498_p1, %p495_p0 }
   0x7   :  { %503 = shalt.err (!%p500_p2)
}
   0x8   :  { %s504_s21 = scalar_lea.vmem %s18_s13, 512  ;;  %p509_p4 = scmp.lt.s32.totalorder %s18_s13, %s18_s13 }
   0x9   :  { %p505_p3 = scmp.ne.s32.totalorder %s18_s13, %s504_s21  ;;  %p510_p5 = scmp.lt.s32.totalorder %s504_s21, %s504_s21 }
   0xb   :  { %p511_p6 = por %p510_p5, %p509_p4 }
   0xd   :  { %p512_p7 = pnand %p511_p6, %p505_p3 }
   0xf   :  { %515 = shalt.err (!%p512_p7)
}
  0x10   :  { %s583_s22 = smov 128   ;;  %s584_s23 = smov 8  }
  0x11   :  { %23 = dma.hbm_to_vmem [thread:$0]  %s734_s1, 512, %s18_s13, [#allocation3], %s583_s22, %s583_s22, %s584_s23  }
  0x12   :  { %558 = dma.done.wait [#allocation3], 512  }
  0x13   :  { %559 = vsyncadd [#allocation3], 4294966784  ;;  %v585_v0 = vmov 0   ;;  %v622_v1 = vld [vmem:[#allocation2] sm:$0xff]  ;;  %v624_v2 = vld [vmem:[#allocation2 + $0x8] sm:$0xff] }
  0x14   :  { %469 = vset.pattern.permute.xlu1 %v585_v0  ;;  %468 = vset.pattern.permute.xlu0 %v585_v0  ;;  %v626_v3 = vld [vmem:[#allocation2 + $0x10] sm:$0xff]  ;;  %v628_v4 = vld [vmem:[#allocation2 + $0x18] sm:$0xff]  ;;  %v37_v6 = vld [vmem:[%s735_s2] sm:$0xff] }
  0x15   :  { %v39_v5 = vld [vmem:[%s735_s2 + $0x10] sm:$0xff]  ;;  %43 = vperm.xlu0 %468, %v37_v6   ;;  %v40_v7 = vld [vmem:[%s735_s2 + $0x18] sm:$0xff]  ;;  %v38_v8 = vld [vmem:[%s735_s2 + $0x8] sm:$0xff] }
  0x16   :  { %53 = vperm.xlu1 %469, %v39_v5   ;;  %v35_v9 = vld [vmem:[%s733_s0 + $0x10] sm:$0xff]  ;;  %v33_v10 = vld [vmem:[%s733_s0] sm:$0xff]  ;;  %v36_v15 = vld [vmem:[%s733_s0 + $0x18] sm:$0xff] }
  0x17   :  { %v34_v16 = vld [vmem:[%s733_s0 + $0x8] sm:$0xff]  ;;  %s674_s0 = smov 1  }
  0x19   :  { %48 = vperm.xlu0 %468, %v38_v8  }
  0x1a   :  { %58 = vperm.xlu1 %469, %v40_v7  }
  0x94   :  { %v44_v12 = vpop.permute.xlu0 %43 }
  0x95   :  { %v54_v11 = vpop.permute.xlu1 %53  ;;  %v650_v14 = vadd.f32 %v44_v12, %v33_v10 }
  0x96   :  { %v648_v13 = vadd.f32 %v54_v11, %v35_v9 }
  0x98   :  { %470 = vtanh.f32 %v648_v13  ;;  %v49_v18 = vpop.permute.xlu0 %48 }
  0x99   :  { %472 = vtanh.f32 %v650_v14  ;;  %v59_v17 = vpop.permute.xlu1 %58  ;;  %v662_v20 = vadd.f32 %v49_v18, %v34_v16 }
  0x9a   :  { %v660_v19 = vadd.f32 %v59_v17, %v36_v15 }
  0x9c   :  { %474 = vtanh.f32 %v660_v19 }
  0x9d   :  { %476 = vtanh.f32 %v662_v20 }
  0xa2   :  { %v471_v21 = vpop.eup %470  }
  0xa3   :  { %v473_v22 = vpop.eup %472  }
  0xa6   :  { %v475_v23 = vpop.eup %474  }
  0xa7   :  { %v477_v24 = vpop.eup %476  }
  0xa8 LB: > { %v403_v25 = vpack.c.bf16 %v572_v24, %v576_v22  ;;  %v407_v26 = vpack.c.bf16 %v564_v23, %v568_v21  ;;  %vm79_vm0 = vcmask 261120   ;;  %s309_s17 = sadd.s32 2, %s580_s0  ;;  %s580_s0 = sphi %s674_s0, %s741_s0   ;;  %v576_v22 = vphi %v473_v22, %v740_v22   ;;  %v572_v24 = vphi %v477_v24, %v739_v24   ;;  %v568_v21 = vphi %v471_v21, %v738_v21   ;;  %v564_v23 = vphi %v475_v23, %v737_v23  }
  0xa9   : > { %383 = vmatprep.mubr.msk.f32.mxu0 %vm79_vm0, %v622_v1  ;;  %397 = vmatprep.mubr.msk.f32.mxu1 %vm79_vm0, %v622_v1 }
  0xaa   : > { %404 = vmatprep.subr.bf16.mxu0 %v403_v25 }
  0xab   : > { %406 = vmatpush3.bf16.msra.mxu0 %v403_v25 }
  0xac   : > { %408 = vmatprep.subr.bf16.mxu0 %v407_v26 }
  0xaf   : > { %410 = vmatpush3.bf16.msra.mxu0 %v407_v26 }
  0xb2   : > { %384 = vmatmul.mubr.msk.f32.vlgmr.msra.gmra.mrb[0].mxu0 %vm79_vm0, %v624_v2 }
  0xb3   : > { %386 = vmatprep.mubr.msk.f32.mxu0 %vm79_vm0, %v626_v3 }
  0xb6   : > { %387 = vmatmul.mubr.msk.f32.gmra.mrb[2].mxu0 %vm79_vm0, %v628_v4 }
 0x185   : > { %v385_v27 = vpop.f32.mrb[0].mxu0 }
 0x186   : > { %v164_v28 = vadd.f32 %v385_v27, %v662_v20  ;;  %v158_v29 = vpop.f32.mrb[1].mxu0 }
 0x187   : > { %v159_v30 = vadd.f32 %v158_v29, %v650_v14 }
 0x188   : > { %478 = vtanh.f32 %v164_v28 }
 0x189   : > { %480 = vtanh.f32 %v159_v30  ;;  %v388_v31 = vpop.f32.mrb[2].mxu0 }
 0x18a   : > { %v174_v32 = vadd.f32 %v388_v31, %v660_v19  ;;  %v168_v33 = vpop.f32.mrb[3].mxu0 }
 0x18b   : > { %v169_v34 = vadd.f32 %v168_v33, %v648_v13 }
 0x18c   : > { %482 = vtanh.f32 %v174_v32 }
 0x18d   : > { %484 = vtanh.f32 %v169_v34 }
 0x192   : > { %v479_v35 = vpop.eup %478 }
 0x193   : > { %v481_v36 = vpop.eup %480 }
 0x194   : > { %v411_v37 = vpack.c.bf16 %v479_v35, %v481_v36 }
 0x196   : > { %v483_v38 = vpop.eup %482  ;;  %412 = vmatprep.subr.bf16.mxu1 %v411_v37 }
 0x197   : > { %v485_v39 = vpop.eup %484  ;;  %414 = vmatpush3.bf16.msra.mxu1 %v411_v37 }
 0x198   : > { %v415_v40 = vpack.c.bf16 %v483_v38, %v485_v39 }
 0x19a   : > { %416 = vmatprep.subr.bf16.mxu1 %v415_v40 }
 0x19b   : > { %418 = vmatpush3.bf16.msra.mxu1 %v415_v40 }
 0x19e   : > { %398 = vmatmul.mubr.msk.f32.vlgmr.msra.gmra.mrb[0].mxu1 %vm79_vm0, %v624_v2 }
 0x19f   : > { %400 = vmatprep.mubr.msk.f32.mxu1 %vm79_vm0, %v626_v3 }
 0x1a2   : > { %401 = vmatmul.mubr.msk.f32.gmra.mrb[2].mxu1 %vm79_vm0, %v628_v4 }
 0x271   : > { %v399_v41 = vpop.f32.mrb[0].mxu1 }
 0x272   : > { %v253_v42 = vadd.f32 %v399_v41, %v662_v20  ;;  %v247_v43 = vpop.f32.mrb[1].mxu1 }
 0x273   : > { %v248_v44 = vadd.f32 %v247_v43, %v650_v14 }
 0x274   : > { %486 = vtanh.f32 %v253_v42 }
 0x275   : > { %488 = vtanh.f32 %v248_v44  ;;  %v402_v45 = vpop.f32.mrb[2].mxu1 }
 0x276   : > { %v263_v46 = vadd.f32 %v402_v45, %v660_v19  ;;  %v257_v47 = vpop.f32.mrb[3].mxu1 }
 0x277   : > { %v258_v48 = vadd.f32 %v257_v47, %v648_v13 }
 0x278   : > { %490 = vtanh.f32 %v263_v46 }
 0x279   : > { %492 = vtanh.f32 %v258_v48 }
 0x27e   : > { %v487_v49 = vpop.eup %486  }
 0x27f   : > { %v489_v50 = vpop.eup %488   ;;  %v271_v51 = vsub.f32 %v487_v49, %v479_v35  ;;  %v291_v52 = vmul.f32 %v487_v49, %v487_v49 }
 0x280   : > { %v270_v53 = vsub.f32 %v489_v50, %v481_v36  ;;  %v290_v54 = vmul.f32 %v489_v50, %v489_v50 }
 0x281   : > { %v275_v55 = vmul.f32 %v271_v51, %v271_v51 }
 0x282   : > { %v491_v56 = vpop.eup %490   ;;  %v274_v57 = vmul.f32 %v270_v53, %v270_v53  ;;  %v294_v58 = vadd.f32 %v291_v52, %v290_v54 }
 0x283   : > { %v493_v59 = vpop.eup %492   ;;  %v273_v61 = vsub.f32 %v491_v56, %v483_v38  ;;  %v293_v5 = vmul.f32 %v491_v56, %v491_v56 }
 0x284   : > { %v272_v60 = vsub.f32 %v493_v59, %v485_v39  ;;  %v278_v62 = vadd.f32 %v275_v55, %v274_v57  ;;  %v292_v63 = vmul.f32 %v493_v59, %v493_v59 }
 0x285   : > { %v277_v7 = vmul.f32 %v273_v61, %v273_v61 }
 0x286   : > { %v276_v0 = vmul.f32 %v272_v60, %v272_v60  ;;  %v295_v6 = vadd.f32 %v294_v58, %v292_v63 }
 0x288   : > { %v279_v8 = vadd.f32 %v278_v62, %v276_v0  ;;  %v296_v9 = vadd.f32 %v295_v6, %v293_v5 }
 0x28a   : > { %v280_v10 = vadd.f32 %v279_v8, %v277_v7 }
 0x28c   : > { %281 = vadd.xlane.f32.xlu0 %v280_v10 }
 0x290   : > { %297 = vadd.xlane.f32.xlu0 %v296_v9 }
 0x319   : > { %v282_v11 = vpop.xlane.xlu0 %281 }
 0x31a   : > { %v283_v12 = vrot.slane %v282_v11, 4 }
 0x31c   : > { %v284_v15 = vadd.f32 %v283_v12, %v282_v11 }
 0x31d   : > { %v298_v16 = vpop.xlane.xlu0 %297 }
 0x31e   : > { %v285_v17 = vrot.slane %v284_v15, 2  ;;  %v299_v18 = vrot.slane %v298_v16, 4 }
 0x320   : > { %v300_v21 = vadd.f32 %v299_v18, %v298_v16  ;;  %v286_v22 = vadd.f32 %v285_v17, %v284_v15 }
 0x322   : > { %v301_v23 = vrot.slane %v300_v21, 2  ;;  %v287_v24 = vrot.slane %v286_v22, 1 }
 0x324   : > { %v302_v25 = vadd.f32 %v301_v23, %v300_v21  ;;  %v288_v26 = vadd.f32 %v287_v24, %v286_v22  ;;  %v737_v23 = vmov %v491_v56  ;;  %v738_v21 = vmov %v493_v59 }
 0x325   : > { %v739_v24 = vmov %v487_v49  ;;  %v740_v22 = vmov %v489_v50 }
 0x326   : > { %419 = vpush %v288_v26  ;;  %v303_v27 = vrot.slane %v302_v25, 1 }
 0x328   : > { %v304_v28 = vadd.f32 %v303_v27, %v302_v25 }
 0x32a   : > { %421 = vpush %v304_v28 }
 0x357   : > { %s420_s13 = spop %419 }
 0x35b   : > { %s422_s14 = spop %421 }
 0x35c   : > { %s306_s15 = sadd.f32 1e-08, %s422_s14 }
 0x35e   : > { %s307_s16 = smul.f32 1e-08, %s306_s15 }
 0x360   : > { %p308_p8 = scmp.lt.f32.partialorder %s420_s13, %s307_s16 }
 0x362   : > { %s743_s17 = smov (%p308_p8, %s309_s17), 30 }
 0x363   : > { %p358_p9 = scmp.ge.s32.totalorder %s743_s17, 30  ;;  %s741_s0 = smov %s743_s17 }
 0x364   :  { %311 = vst [vmem:[#allocation5] sm:$0xff] (%p358_p9), %v489_v50  ;;  %312 = vst [vmem:[#allocation5 + $0x8] sm:$0xff] (%p358_p9), %v487_v49  ;;  %s586_s18 = smov (%p358_p9), [#allocation5]  }
 0x365   :  { %78 = sbr.rel (!%p358_p9) target bundleno = 168 (0xa8), region = 43  ;;  %313 = vst [vmem:[#allocation5 + $0x10] sm:$0xff] (%p358_p9), %v493_v59  ;;  %314 = vst [vmem:[#allocation5 + $0x18] sm:$0xff] (%p358_p9), %v491_v56  ;;  %s320_s19 = sshll.u32 (%p358_p9), %s586_s18, 4  ;;  %s321_s19 = int_to_ptr.vmem [resolvable:$true] %s320_s19 }
 0x366   :  { %s516_s20 = scalar_lea.vmem (%p358_p9), %s321_s19, 512  ;;  %p521_p11 = scmp.lt.s32.totalorder (%p358_p9), %s321_s19, %s321_s19 }
 0x367   :  { %p517_p10 = scmp.ne.s32.totalorder (%p358_p9), %s321_s19, %s516_s20  ;;  %p522_p12 = scmp.lt.s32.totalorder (%p358_p9), %s516_s20, %s516_s20 }
 0x369   :  { %p523_p13 = por (%p358_p9), %p522_p12, %p521_p11 }
 0x36b   :  { %p524_p0 = pnand (%p358_p9), %p523_p13, %p517_p10 }
 0x36d   :  { %527 = shalt.err (!%p524_p0)
}
 0x36e   :  { %s528_s25 = scalar_lea.hbm %s736_s3, 512 }
 0x36f   :  { %p529_p1 = scmp.ne.s32.totalorder %s736_s3, %s528_s25  ;;  %p532_p2 = scmp.lt.u32.totalorder %s528_s25, %s736_s3 }
 0x371   :  { %p534_p3 = pnand %p532_p2, %p529_p1 }
 0x373   :  { %537 = shalt.err (!%p534_p3)
}
 0x374   :  { %326 = dma.vmem_to_hbm [thread:$0]  %s321_s19, 512, %s736_s3, [#allocation4], %s583_s22, %s583_s22, %s584_s23  }
 0x375   :  { %560 = dma.done.wait [#allocation4], 512  }
 0x376   :  { %561 = vsyncadd [#allocation4], 4294966784 }
 0x377   :  { %330 = vsyncpa [#allocation3], 1 }
 0x378   :  { %331 = vsyncpa [#allocation4], 1 }

</bundles_post_ra>
